<compile_context>
chip_gen: v6e
topology: v6e:2x2x1
jax: 0.10.0
libtpu: 0.0.40
codegen_flags: <defaults>
</compile_context>

<pallas_src>
import math

import jax
import jax.numpy as jnp
from jax.experimental import pallas as pl
from jax.experimental.pallas import tpu as pltpu


def transformer_vector_kernel(
    x_ref,      # (S, H) f32  — one batch row of x (residual + q/k/v source)
    wqkv_ref,   # (H, 3K) bf16 — fused wq|wk|wv
    wa_ref,     # (K, H) bf16  — self_attention_aggr
    wf_ref,     # (H, H) bf16  — ffnn
    bqkv_ref,   # (1, 3K) f32  — fused bq|bk|bv (1/sqrt(K) already folded into bq)
    vecs_ref,   # (6, H) f32   — rows: ba, g1, be1, b_ffnn, g2, be2
    out_ref,    # (S, H) f32
):
    eps = 1e-5
    kvq = wa_ref.shape[0]

    x = x_ref[...]                       # f32, used for the residual / layer norms
    x_b = x.astype(jnp.bfloat16)         # single cast point, reused by the MXU

    ba = vecs_ref[0:1, :]
    g1 = vecs_ref[1:2, :]
    be1 = vecs_ref[2:3, :]
    bff = vecs_ref[3:4, :]
    g2 = vecs_ref[4:5, :]
    be2 = vecs_ref[5:6, :]

    # --- fused q / k / v projection: one (S,H)x(H,3K) MXU pass -----------------
    qkv = jnp.dot(x_b, wqkv_ref[...],
                  preferred_element_type=jnp.float32) + bqkv_ref[...]   # (S,3K) f32
    q = qkv[:, 0 * kvq:1 * kvq].astype(jnp.bfloat16)   # scale already folded in
    k = qkv[:, 1 * kvq:2 * kvq].astype(jnp.bfloat16)
    v = qkv[:, 2 * kvq:3 * kvq].astype(jnp.bfloat16)

    # --- scores = q @ k^T (contract last dims, once per batch row) -------------
    scores = jax.lax.dot_general(
        q, k, (((1,), (1,)), ((), ())),
        preferred_element_type=jnp.float32)             # (S, S) f32

    # Numerically-stable softmax; divide -> EUP reciprocal + VPU multiply.
    scores = scores - jnp.max(scores, axis=-1, keepdims=True)
    p = jnp.exp(scores)
    inv = pl.reciprocal(jnp.sum(p, axis=-1, keepdims=True), approx=True)
    attn = (p * inv).astype(jnp.bfloat16)

    ctx = jnp.dot(attn, v, preferred_element_type=jnp.float32)          # (S, K)

    # --- self_attention_aggr linear ---------------------------------------------
    y = jnp.dot(ctx.astype(jnp.bfloat16), wa_ref[...],
                preferred_element_type=jnp.float32) + ba                # (S, H)

    # --- layer_norm1(y + x) — f32 VPU math ---------------------------------------
    h1 = y + x
    mu1 = jnp.mean(h1, axis=-1, keepdims=True)
    d1 = h1 - mu1
    var1 = jnp.mean(d1 * d1, axis=-1, keepdims=True)
    h1 = d1 * jax.lax.rsqrt(var1 + eps) * g1 + be1

    # --- ffnn --------------------------------------------------------------------
    z = jnp.dot(h1.astype(jnp.bfloat16), wf_ref[...],
                preferred_element_type=jnp.float32) + bff

    # --- layer_norm2(z + h1) -------------------------------------------------------
    h2 = z + h1
    mu2 = jnp.mean(h2, axis=-1, keepdims=True)
    d2 = h2 - mu2
    var2 = jnp.mean(d2 * d2, axis=-1, keepdims=True)
    out_ref[...] = (d2 * jax.lax.rsqrt(var2 + eps) * g2 + be2).astype(out_ref.dtype)


# ----------------------------------------------------------------------------
# Build / cache machinery (no per-call retracing, no per-call try/except).
# ----------------------------------------------------------------------------

_BUFFERED1_SUPPORTED = None   # decided once, lazily
_FN_CACHE = {}


def _probe_buffered1():
    """One-time tiny compile to decide whether pl.Buffered(1) single-buffering
    of constant-index (resident) blocks is supported by this jax build."""
    try:
        def copy_kernel(x_ref, o_ref):
            o_ref[...] = x_ref[...]

        fn = pl.pallas_call(
            copy_kernel,
            out_shape=jax.ShapeDtypeStruct((8, 128), jnp.float32),
            grid_spec=pltpu.PrefetchScalarGridSpec(
                num_scalar_prefetch=0,
                grid=(2,),
                in_specs=[pl.BlockSpec((8, 128), lambda i: (0, 0),
                                       pipeline_mode=pl.Buffered(1))],
                out_specs=pl.BlockSpec((8, 128), lambda i: (0, 0)),
            ),
        )
        jax.block_until_ready(fn(jnp.zeros((8, 128), jnp.float32)))
        return True
    except Exception:
        return False


def _build_pallas_fn(B, S, H, K, single_buffer_weights):
    grid = (B,)  # one batch row per step; all in-kernel math stays 2-D

    def weight_spec(shape):
        idx = lambda b: tuple(0 for _ in shape)
        if single_buffer_weights:
            # Constant block index across the grid -> single-buffered residency.
            return pl.BlockSpec(shape, idx, pipeline_mode=pl.Buffered(1))
        return pl.BlockSpec(shape, idx)

    in_specs = [
        pl.BlockSpec((None, S, H), lambda b: (b, 0, 0)),   # x (single f32 copy)
        weight_spec((H, 3 * K)),                           # fused wqkv (bf16)
        weight_spec((K, H)),                               # wa (bf16)
        weight_spec((H, H)),                               # wf (bf16)
        weight_spec((1, 3 * K)),                           # fused qkv bias (f32)
        weight_spec((6, H)),                               # packed aggr/ffnn/LN vecs
    ]
    out_spec = pl.BlockSpec((None, S, H), lambda b: (b, 0, 0))

    # VMEM residency: bf16 weights (+f32 bias vectors), accounting for the
    # double-buffered fallback, double-buffered f32 x / out blocks, and the
    # per-step f32 intermediates, with headroom for Mosaic internal scratch.
    w_copies = 1 if single_buffer_weights else 2
    weight_bytes = w_copies * ((H * 3 * K + K * H + H * H) * 2
                               + (3 * K + 6 * H) * 4)
    io_bytes = 2 * 2 * (S * H * 4)                       # x + out, double-buffered
    inter_bytes = (2 * S * 3 * K + 2 * S * S + 2 * S * K + 6 * S * H) * 4
    need = weight_bytes + io_bytes + inter_bytes

    cap = 48 * 2**20                                     # safe default (v7x: 64 MiB)
    try:
        info = pltpu.get_tpu_info()
        vmem_cap = getattr(info, "vmem_capacity_bytes", None)
        if vmem_cap is not None:
            cap = 48 * 2**20 if vmem_cap <= 64 * 2**20 else 100 * 2**20
    except Exception:
        pass
    vmem_limit = int(min(cap, max(32 * 2**20, 4 * need)))

    return pl.pallas_call(
        transformer_vector_kernel,
        out_shape=jax.ShapeDtypeStruct((B, S, H), jnp.float32),
        grid_spec=pltpu.PrefetchScalarGridSpec(
            num_scalar_prefetch=0,
            grid=grid,
            in_specs=in_specs,
            out_specs=out_spec,
        ),
        compiler_params=pltpu.CompilerParams(
            dimension_semantics=("parallel",),    # batch rows shard across TCs
            vmem_limit_bytes=vmem_limit,
        ),
    )


def _get_kernel_fn(B, S, H, K):
    global _BUFFERED1_SUPPORTED
    if _BUFFERED1_SUPPORTED is None:
        _BUFFERED1_SUPPORTED = _probe_buffered1()
    key = (B, S, H, K, _BUFFERED1_SUPPORTED)
    fn = _FN_CACHE.get(key)
    if fn is None:
        fn = _build_pallas_fn(B, S, H, K, _BUFFERED1_SUPPORTED)
        _FN_CACHE[key] = fn
    return fn


# ----------------------------------------------------------------------------
# Public wrapper + parameter packing (done once, off the hot path).
# ----------------------------------------------------------------------------

def prepare_params(params, kvq_size):
    """One-time packing: fuse wq|wk|wv into (H,3K) bf16, fold 1/sqrt(K) into the
    q projection, pack the nine tiny bias/LN vectors into two f32 arrays."""
    (wq, bq, wk, bk, wv, bv, wa, ba, g1, be1, wf, bf, g2, be2) = params
    scale = 1.0 / math.sqrt(kvq_size)
    wqkv = jnp.concatenate([wq * scale, wk, wv], axis=1).astype(jnp.bfloat16)   # (H,3K)
    bqkv = jnp.concatenate([bq * scale, bk, bv], axis=1).astype(jnp.float32)    # (1,3K)
    wa_b = wa.astype(jnp.bfloat16)
    wf_b = wf.astype(jnp.bfloat16)
    vecs = jnp.concatenate([ba, g1, be1, bf, g2, be2], axis=0).astype(jnp.float32)  # (6,H)
    return (wqkv, wa_b, wf_b, bqkv, vecs)


def transformer_vector_layer(x, prepared_params, kvq_size):
    """x: (B, S, H) float32. prepared_params: output of prepare_params."""
    B, S, H = x.shape
    fn = _get_kernel_fn(B, S, H, kvq_size)
    return fn(x, *prepared_params)


# ----------------------------------------------------------------------------
# Deterministic synthetic parameters + pure-JAX reference.
# ----------------------------------------------------------------------------

def init_params(key, hidden_size, kvq_size):
    """Deterministic synthetic parameters (linear weights stored as (in, out))."""
    H, K = hidden_size, kvq_size
    ks = jax.random.split(key, 10)

    def lin(k, fan_in, fan_out):
        kw, kb = jax.random.split(k)
        bound = 1.0 / math.sqrt(fan_in)
        w = jax.random.uniform(kw, (fan_in, fan_out), jnp.float32, -bound, bound)
        b = jax.random.uniform(kb, (1, fan_out), jnp.float32, -bound, bound)
        return w, b

    wq, bq = lin(ks[0], H, K)
    wk, bk = lin(ks[1], H, K)
    wv, bv = lin(ks[2], H, K)
    wa, ba = lin(ks[3], K, H)
    wf, bf = lin(ks[4], H, H)
    g1 = jnp.ones((1, H), jnp.float32)
    be1 = jnp.zeros((1, H), jnp.float32)
    g2 = jnp.ones((1, H), jnp.float32)
    be2 = jnp.zeros((1, H), jnp.float32)
    return (wq, bq, wk, bk, wv, bv, wa, ba, g1, be1, wf, bf, g2, be2)


def reference_forward(x, params, kvq_size, eps=1e-5):
    """Pure-JAX f32 reference matching the PyTorch forward semantics."""
    (wq, bq, wk, bk, wv, bv, wa, ba, g1, be1, wf, bf, g2, be2) = params
    q = x @ wq + bq
    k = x @ wk + bk
    v = x @ wv + bv
    scores = jnp.einsum('bqd,bkd->bqk', q, k) / math.sqrt(kvq_size)
    attn = jax.nn.softmax(scores, axis=-1)
    y = jnp.einsum('bqk,bkd->bqd', attn, v) @ wa + ba

    def ln(h, g, b):
        mu = jnp.mean(h, axis=-1, keepdims=True)
        var = jnp.mean((h - mu) ** 2, axis=-1, keepdims=True)
        return (h - mu) * jax.lax.rsqrt(var + eps) * g + b

    y = ln(y + x, g1, be1)
    z = y @ wf + bf
    return ln(z + y, g2, be2)


if __name__ == "__main__":
    batch, seq, hidden, kvq = 2, 8, 32, 64

    key = jax.random.PRNGKey(0)
    kx, kp = jax.random.split(key)
    x = jax.random.normal(kx, (batch, seq, hidden), jnp.float32)
    params = init_params(kp, hidden, kvq)

    prepared = prepare_params(params, kvq)          # one-time packing / bf16 cast
    out = transformer_vector_layer(x, prepared, kvq)
    out = jax.block_until_ready(out)

    ref = reference_forward(x, params, kvq)
    assert out.shape == (batch, seq, hidden)
    max_err = float(jnp.max(jnp.abs(out - ref)))
    # bf16 MXU operands + approx reciprocal -> loosened tolerance vs f32 reference.
    assert jnp.allclose(out, ref, atol=5e-2, rtol=5e-2), max_err

    print("KERNEL_OK")
</pallas_src>

<mosaic_0001>
module attributes {stable_mosaic.version = 11 : i64} {
  func.func @copy_kernel(%arg0: i32, %arg1: memref<8x128xf32, #tpu.memory_space<vmem>>, %arg2: memref<8x128xf32, #tpu.memory_space<vmem>>) attributes {dimension_semantics = [#tpu.dimension_semantics<arbitrary>], iteration_bounds = array<i64: 2>, scalar_prefetch = 0 : i64, scratch_operands = 0 : i64, tpu.core_type = #tpu.core_type<tc>, window_params = [{pipeline_mode = #tpu.pipeline_mode<synchronous>, transform_indices = @transform_0, window_bounds = array<i64: 8, 128>}, {pipeline_mode = #tpu.pipeline_mode<synchronous>, transform_indices = @transform_1, window_bounds = array<i64: 8, 128>}]} {
    %c0 = arith.constant 0 : index
    %c0_0 = arith.constant 0 : index
    %0 = vector.load %arg1[%c0, %c0_0] : memref<8x128xf32, #tpu.memory_space<vmem>>, vector<8x128xf32>
    %c0_1 = arith.constant 0 : index
    %c0_2 = arith.constant 0 : index
    %1 = vector.load %arg2[%c0_1, %c0_2] : memref<8x128xf32, #tpu.memory_space<vmem>>, vector<8x128xf32>
    tpu.vector_store %arg2[%c0_1, %c0_2], %0 {strides = array<i32>} : memref<8x128xf32, #tpu.memory_space<vmem>>, vector<8x128xf32>,
    return
  }
  func.func @transform_0(%arg0: i32) -> (i32, i32) {
    %c0_i32 = arith.constant 0 : i32
    %c0_i32_0 = arith.constant 0 : i32
    %c0_i32_1 = arith.constant 0 : i32
    return %c0_i32, %c0_i32_0 : i32, i32
  }
  func.func @transform_1(%arg0: i32) -> (i32, i32) {
    %c0_i32 = arith.constant 0 : i32
    %c0_i32_0 = arith.constant 0 : i32
    %c0_i32_1 = arith.constant 0 : i32
    return %c0_i32, %c0_i32_0 : i32, i32
  }
}

module attributes {stable_mosaic.version = 11 : i64} {
  func.func @transformer_vector_kernel(%arg0: i32, %arg1: memref<1x8x32xf32, #tpu.memory_space<vmem>>, %arg2: memref<32x192xbf16, #tpu.memory_space<vmem>>, %arg3: memref<64x32xbf16, #tpu.memory_space<vmem>>, %arg4: memref<32x32xbf16, #tpu.memory_space<vmem>>, %arg5: memref<1x192xf32, #tpu.memory_space<vmem>>, %arg6: memref<6x32xf32, #tpu.memory_space<vmem>>, %arg7: memref<1x8x32xf32, #tpu.memory_space<vmem>>) attributes {dimension_semantics = [#tpu.dimension_semantics<parallel>], iteration_bounds = array<i64: 2>, scalar_prefetch = 0 : i64, scratch_operands = 0 : i64, tpu.core_type = #tpu.core_type<tc>, window_params = [{transform_indices = @transform_0, window_bounds = array<i64: 1, 8, 32>}, {pipeline_mode = #tpu.pipeline_mode<synchronous>, transform_indices = @transform_1, window_bounds = array<i64: 32, 192>}, {pipeline_mode = #tpu.pipeline_mode<synchronous>, transform_indices = @transform_2, window_bounds = array<i64: 64, 32>}, {pipeline_mode = #tpu.pipeline_mode<synchronous>, transform_indices = @transform_3, window_bounds = array<i64: 32, 32>}, {pipeline_mode = #tpu.pipeline_mode<synchronous>, transform_indices = @transform_4, window_bounds = array<i64: 1, 192>}, {pipeline_mode = #tpu.pipeline_mode<synchronous>, transform_indices = @transform_5, window_bounds = array<i64: 6, 32>}, {transform_indices = @transform_6, window_bounds = array<i64: 1, 8, 32>}]} {
    %c0 = arith.constant 0 : index
    %c0_0 = arith.constant 0 : index
    %c0_1 = arith.constant 0 : index
    %0 = vector.load %arg1[%c0, %c0_0, %c0_1] : memref<1x8x32xf32, #tpu.memory_space<vmem>>, vector<1x8x32xf32>
    %1 = vector.shape_cast %0 : vector<1x8x32xf32> to vector<8x32xf32>
    %2 = arith.truncf %1 : vector<8x32xf32> to vector<8x32xbf16>
    %c0_2 = arith.constant 0 : index
    %c0_3 = arith.constant 0 : index
    %3 = vector.load %arg6[%c0_2, %c0_3] : memref<6x32xf32, #tpu.memory_space<vmem>>, vector<1x32xf32>
    %c1 = arith.constant 1 : index
    %c0_4 = arith.constant 0 : index
    %4 = vector.load %arg6[%c1, %c0_4] : memref<6x32xf32, #tpu.memory_space<vmem>>, vector<1x32xf32>
    %c2 = arith.constant 2 : index
    %c0_5 = arith.constant 0 : index
    %5 = vector.load %arg6[%c2, %c0_5] : memref<6x32xf32, #tpu.memory_space<vmem>>, vector<1x32xf32>
    %c3 = arith.constant 3 : index
    %c0_6 = arith.constant 0 : index
    %6 = vector.load %arg6[%c3, %c0_6] : memref<6x32xf32, #tpu.memory_space<vmem>>, vector<1x32xf32>
    %c4 = arith.constant 4 : index
    %c0_7 = arith.constant 0 : index
    %7 = vector.load %arg6[%c4, %c0_7] : memref<6x32xf32, #tpu.memory_space<vmem>>, vector<1x32xf32>
    %c5 = arith.constant 5 : index
    %c0_8 = arith.constant 0 : index
    %8 = vector.load %arg6[%c5, %c0_8] : memref<6x32xf32, #tpu.memory_space<vmem>>, vector<1x32xf32>
    %c0_9 = arith.constant 0 : index
    %c0_10 = arith.constant 0 : index
    %9 = vector.load %arg2[%c0_9, %c0_10] : memref<32x192xbf16, #tpu.memory_space<vmem>>, vector<32x192xbf16>
    %cst = arith.constant dense<0.000000e+00> : vector<8x192xf32>
    %10 = tpu.matmul %2, %9, %cst {dimension_numbers = #tpu.dot_dimension_numbers<[1], [0], [0], [1], [0, 0, 1, 1], [], []>} : vector<8x32xbf16>, vector<32x192xbf16>, vector<8x192xf32> -> vector<8x192xf32>
    %c0_11 = arith.constant 0 : index
    %c0_12 = arith.constant 0 : index
    %11 = vector.load %arg5[%c0_11, %c0_12] : memref<1x192xf32, #tpu.memory_space<vmem>>, vector<1x192xf32>
    %12 = vector.broadcast %11 : vector<1x192xf32> to vector<8x192xf32>
    %13 = arith.addf %10, %12 : vector<8x192xf32>
    %14 = vector.extract_strided_slice %13 {offsets = [0, 0], sizes = [8, 64], strides = [1, 1]} : vector<8x192xf32> to vector<8x64xf32>
    %15 = arith.truncf %14 : vector<8x64xf32> to vector<8x64xbf16>
    %16 = vector.extract_strided_slice %13 {offsets = [0, 64], sizes = [8, 64], strides = [1, 1]} : vector<8x192xf32> to vector<8x64xf32>
    %17 = arith.truncf %16 : vector<8x64xf32> to vector<8x64xbf16>
    %18 = vector.extract_strided_slice %13 {offsets = [0, 128], sizes = [8, 64], strides = [1, 1]} : vector<8x192xf32> to vector<8x64xf32>
    %19 = arith.truncf %18 : vector<8x64xf32> to vector<8x64xbf16>
    %cst_13 = arith.constant dense<0.000000e+00> : vector<8x8xf32>
    %20 = tpu.matmul %15, %17, %cst_13 {dimension_numbers = #tpu.dot_dimension_numbers<[1], [1], [0], [0], [0, 0, 1, 0], [], []>} : vector<8x64xbf16>, vector<8x64xbf16>, vector<8x8xf32> -> vector<8x8xf32>
    %cst_14 = arith.constant dense<0xFF800000> : vector<8xf32>
    %21 = vector.multi_reduction <maximumf>, %20, %cst_14 [1] : vector<8x8xf32> to vector<8xf32>
    %22 = vector.shape_cast %21 : vector<8xf32> to vector<8x1xf32>
    %23 = vector.broadcast %22 : vector<8x1xf32> to vector<8x8xf32>
    %24 = arith.subf %20, %23 : vector<8x8xf32>
    %25 = math.exp %24 : vector<8x8xf32>
    %cst_15 = arith.constant dense<0.000000e+00> : vector<8xf32>
    %26 = vector.multi_reduction <add>, %25, %cst_15 [1] : vector<8x8xf32> to vector<8xf32>
    %27 = vector.shape_cast %26 : vector<8xf32> to vector<8x1xf32>
    %28 = tpu.reciprocal %27 {approx = true} : vector<8x1xf32> -> vector<8x1xf32>
    %29 = vector.broadcast %28 : vector<8x1xf32> to vector<8x8xf32>
    %30 = arith.mulf %25, %29 : vector<8x8xf32>
    %31 = arith.truncf %30 : vector<8x8xf32> to vector<8x8xbf16>
    %cst_16 = arith.constant dense<0.000000e+00> : vector<8x64xf32>
    %32 = tpu.matmul %31, %19, %cst_16 {dimension_numbers = #tpu.dot_dimension_numbers<[1], [0], [0], [1], [0, 0, 1, 1], [], []>} : vector<8x8xbf16>, vector<8x64xbf16>, vector<8x64xf32> -> vector<8x64xf32>
    %33 = arith.truncf %32 : vector<8x64xf32> to vector<8x64xbf16>
    %c0_17 = arith.constant 0 : index
    %c0_18 = arith.constant 0 : index
    %34 = vector.load %arg3[%c0_17, %c0_18] : memref<64x32xbf16, #tpu.memory_space<vmem>>, vector<64x32xbf16>
    %cst_19 = arith.constant dense<0.000000e+00> : vector<8x32xf32>
    %35 = tpu.matmul %33, %34, %cst_19 {dimension_numbers = #tpu.dot_dimension_numbers<[1], [0], [0], [1], [0, 0, 1, 1], [], []>} : vector<8x64xbf16>, vector<64x32xbf16>, vector<8x32xf32> -> vector<8x32xf32>
    %36 = vector.broadcast %3 : vector<1x32xf32> to vector<8x32xf32>
    %37 = arith.addf %35, %36 : vector<8x32xf32>
    %38 = arith.addf %37, %1 : vector<8x32xf32>
    %cst_20 = arith.constant dense<0.000000e+00> : vector<8xf32>
    %39 = vector.multi_reduction <add>, %38, %cst_20 [1] : vector<8x32xf32> to vector<8xf32>
    %40 = vector.shape_cast %39 : vector<8xf32> to vector<8x1xf32>
    %cst_21 = arith.constant 3.200000e+01 : f32
    %41 = vector.broadcast %cst_21 : f32 to vector<8x1xf32>
    %42 = arith.divf %40, %41 : vector<8x1xf32>
    %43 = vector.broadcast %42 : vector<8x1xf32> to vector<8x32xf32>
    %44 = arith.subf %38, %43 : vector<8x32xf32>
    %45 = arith.mulf %44, %44 : vector<8x32xf32>
    %cst_22 = arith.constant dense<0.000000e+00> : vector<8xf32>
    %46 = vector.multi_reduction <add>, %45, %cst_22 [1] : vector<8x32xf32> to vector<8xf32>
    %47 = vector.shape_cast %46 : vector<8xf32> to vector<8x1xf32>
    %cst_23 = arith.constant 3.200000e+01 : f32
    %48 = vector.broadcast %cst_23 : f32 to vector<8x1xf32>
    %49 = arith.divf %47, %48 : vector<8x1xf32>
    %cst_24 = arith.constant 9.99999974E-6 : f32
    %50 = vector.broadcast %cst_24 : f32 to vector<8x1xf32>
    %51 = arith.addf %49, %50 : vector<8x1xf32>
    %52 = math.rsqrt %51 : vector<8x1xf32>
    %53 = vector.broadcast %52 : vector<8x1xf32> to vector<8x32xf32>
    %54 = arith.mulf %44, %53 : vector<8x32xf32>
    %55 = vector.broadcast %4 : vector<1x32xf32> to vector<8x32xf32>
    %56 = arith.mulf %54, %55 : vector<8x32xf32>
    %57 = vector.broadcast %5 : vector<1x32xf32> to vector<8x32xf32>
    %58 = arith.addf %56, %57 : vector<8x32xf32>
    %59 = arith.truncf %58 : vector<8x32xf32> to vector<8x32xbf16>
    %c0_25 = arith.constant 0 : index
    %c0_26 = arith.constant 0 : index
    %60 = vector.load %arg4[%c0_25, %c0_26] : memref<32x32xbf16, #tpu.memory_space<vmem>>, vector<32x32xbf16>
    %cst_27 = arith.constant dense<0.000000e+00> : vector<8x32xf32>
    %61 = tpu.matmul %59, %60, %cst_27 {dimension_numbers = #tpu.dot_dimension_numbers<[1], [0], [0], [1], [0, 0, 1, 1], [], []>} : vector<8x32xbf16>, vector<32x32xbf16>, vector<8x32xf32> -> vector<8x32xf32>
    %62 = vector.broadcast %6 : vector<1x32xf32> to vector<8x32xf32>
    %63 = arith.addf %61, %62 : vector<8x32xf32>
    %64 = arith.addf %63, %58 : vector<8x32xf32>
    %cst_28 = arith.constant dense<0.000000e+00> : vector<8xf32>
    %65 = vector.multi_reduction <add>, %64, %cst_28 [1] : vector<8x32xf32> to vector<8xf32>
    %66 = vector.shape_cast %65 : vector<8xf32> to vector<8x1xf32>
    %cst_29 = arith.constant 3.200000e+01 : f32
    %67 = vector.broadcast %cst_29 : f32 to vector<8x1xf32>
    %68 = arith.divf %66, %67 : vector<8x1xf32>
    %69 = vector.broadcast %68 : vector<8x1xf32> to vector<8x32xf32>
    %70 = arith.subf %64, %69 : vector<8x32xf32>
    %71 = arith.mulf %70, %70 : vector<8x32xf32>
    %cst_30 = arith.constant dense<0.000000e+00> : vector<8xf32>
    %72 = vector.multi_reduction <add>, %71, %cst_30 [1] : vector<8x32xf32> to vector<8xf32>
    %73 = vector.shape_cast %72 : vector<8xf32> to vector<8x1xf32>
    %cst_31 = arith.constant 3.200000e+01 : f32
    %74 = vector.broadcast %cst_31 : f32 to vector<8x1xf32>
    %75 = arith.divf %73, %74 : vector<8x1xf32>
    %cst_32 = arith.constant 9.99999974E-6 : f32
    %76 = vector.broadcast %cst_32 : f32 to vector<8x1xf32>
    %77 = arith.addf %75, %76 : vector<8x1xf32>
    %78 = math.rsqrt %77 : vector<8x1xf32>
    %79 = vector.broadcast %78 : vector<8x1xf32> to vector<8x32xf32>
    %80 = arith.mulf %70, %79 : vector<8x32xf32>
    %81 = vector.broadcast %7 : vector<1x32xf32> to vector<8x32xf32>
    %82 = arith.mulf %80, %81 : vector<8x32xf32>
    %83 = vector.broadcast %8 : vector<1x32xf32> to vector<8x32xf32>
    %84 = arith.addf %82, %83 : vector<8x32xf32>
    %c0_33 = arith.constant 0 : index
    %c0_34 = arith.constant 0 : index
    %c0_35 = arith.constant 0 : index
    %85 = vector.load %arg7[%c0_33, %c0_34, %c0_35] : memref<1x8x32xf32, #tpu.memory_space<vmem>>, vector<1x8x32xf32>
    %86 = vector.shape_cast %85 : vector<1x8x32xf32> to vector<8x32xf32>
    %87 = vector.shape_cast %84 : vector<8x32xf32> to vector<1x8x32xf32>
    tpu.vector_store %arg7[%c0_33, %c0_34, %c0_35], %87 {strides = array<i32>} : memref<1x8x32xf32, #tpu.memory_space<vmem>>, vector<1x8x32xf32>,
    return
  }
  func.func @transform_0(%arg0: i32) -> (i32, i32, i32) {
    %c0_i32 = arith.constant 0 : i32
    %c0_i32_0 = arith.constant 0 : i32
    %c0_i32_1 = arith.constant 0 : i32
    return %arg0, %c0_i32, %c0_i32_0 : i32, i32, i32
  }
  func.func @transform_1(%arg0: i32) -> (i32, i32) {
    %c0_i32 = arith.constant 0 : i32
    %c0_i32_0 = arith.constant 0 : i32
    %c0_i32_1 = arith.constant 0 : i32
    return %c0_i32, %c0_i32_0 : i32, i32
  }
  func.func @transform_2(%arg0: i32) -> (i32, i32) {
    %c0_i32 = arith.constant 0 : i32
    %c0_i32_0 = arith.constant 0 : i32
    %c0_i32_1 = arith.constant 0 : i32
    return %c0_i32, %c0_i32_0 : i32, i32
  }
  func.func @transform_3(%arg0: i32) -> (i32, i32) {
    %c0_i32 = arith.constant 0 : i32
    %c0_i32_0 = arith.constant 0 : i32
    %c0_i32_1 = arith.constant 0 : i32
    return %c0_i32, %c0_i32_0 : i32, i32
  }
  func.func @transform_4(%arg0: i32) -> (i32, i32) {
    %c0_i32 = arith.constant 0 : i32
    %c0_i32_0 = arith.constant 0 : i32
    %c0_i32_1 = arith.constant 0 : i32
    return %c0_i32, %c0_i32_0 : i32, i32
  }
  func.func @transform_5(%arg0: i32) -> (i32, i32) {
    %c0_i32 = arith.constant 0 : i32
    %c0_i32_0 = arith.constant 0 : i32
    %c0_i32_1 = arith.constant 0 : i32
    return %c0_i32, %c0_i32_0 : i32, i32
  }
  func.func @transform_6(%arg0: i32) -> (i32, i32, i32) {
    %c0_i32 = arith.constant 0 : i32
    %c0_i32_0 = arith.constant 0 : i32
    %c0_i32_1 = arith.constant 0 : i32
    return %arg0, %c0_i32, %c0_i32_0 : i32, i32, i32
  }
}

</mosaic_0001>

<bundles_post_ra>
// kernel: tpu_custom_call.1
= control target key start
LH: loop header
LB: loop body
LE: loop exit
PB: predicated region body
PF: predicated region fallthrough
CT: control target
= control target key end

     0   :  { %6 = vsyncpa [#allocation3], 0  ;;  %s304_s0 = inlined_call_operand.hbm [shape: f32[8,128], index: 0, kind: input, shape index: {}]   ;;  %s305_s1 = inlined_call_operand.hbm [shape: f32[8,128], index: 1, kind: output, shape index: {}]  }
   0x1   :  { %7 = vsyncpa [#allocation4], 0  ;;  %s257_s6 = smov 0  }
   0x2 LB: > { %s144_s7 = sadd.s32 4294967295, %s243_s6   ;;  %p145_p0 = scmp.ge.s32.totalorder %s243_s6, 1  ;;  %s243_s6 = sphi %s257_s6, %s13_s6  }
   0x3   : > { %p60_p1 = scmp.lt.s32.totalorder %s243_s6, 3  ;;  %p269_p3 = scmp.eq.s32.totalorder %s144_s7, 0 }
   0x4   : > { %s245_s10 = smov [#allocation2]  }
   0x5   : > { %p265_p2 = pnand %p145_p0, %p60_p1  ;;  %s73_s11 = sshll.u32 %s245_s10, 4  ;;  %s74_s11 = int_to_ptr.vmem [resolvable:$true] %s73_s11 }
   0x6   : > { %s190_s12 = scalar_lea.vmem %s74_s11, 128  ;;  %p198_p10 = scmp.lt.s32.totalorder %s74_s11, %s74_s11 }
   0x7   : > { %p161_p4 = pneg %p265_p2  ;;  %p191_p7 = scmp.ne.s32.totalorder %s74_s11, %s190_s12 }
   0x8   : > { %p199_p11 = scmp.lt.s32.totalorder %s190_s12, %s190_s12 }
   0x9   : > { %p162_p5 = pnand %p269_p3, %p161_p4 }
   0xa   : > { %p200_p12 = por %p199_p11, %p198_p10 }
   0xb   : > { %p181_p6 = pneg %p162_p5 }
   0xd   : > { %p193_p8 = pnand %p191_p7, %p181_p6 }
   0xf   : > { %p194_p9 = pneg %p193_p8 }
  0x11   : > { %p201_p13 = pnand %p200_p12, %p194_p9 }
  0x13   : > { %204 = shalt.err (!%p201_p13)
}
  0x14   : > { %164 = dma.hbm_to_vmem [thread:$0]  (!%p162_p5), %s304_s0, 128, %s74_s11, [#allocation3]  }
  0x15   : > { %86 = sbr.rel (%p265_p2) target bundleno = 42 (0x2a), region = 24 }
  0x1a   : > { %234 = dma.done.wait (%p269_p3), [#allocation3], 128  }
  0x1b   : > { %236 = vsyncadd (%p269_p3), [#allocation3], 4294967168  ;;  %s246_s15 = smov [#allocation5]   ;;  %p286_p0 = scmp.eq.s32.totalorder %s144_s7, 1  ;;  %v96_v0 = vld [vmem:[#allocation2] sm:$0xff] }
  0x1c   : > { %s105_s16 = sshll.u32 %s246_s15, 4  ;;  %97 = vst [vmem:[#allocation5] sm:$0xff] %v96_v0  ;;  %s106_s16 = int_to_ptr.vmem [resolvable:$true] %s105_s16 }
  0x1d   : > { %s205_s18 = scalar_lea.vmem %s106_s16, 128  ;;  %p212_p5 = scmp.lt.s32.totalorder %s106_s16, %s106_s16 }
  0x1e   : > { %p206_p1 = scmp.ne.s32.totalorder %s106_s16, %s205_s18  ;;  %p213_p6 = scmp.lt.s32.totalorder %s205_s18, %s205_s18 }
  0x20   : > { %p207_p2 = pnand %p206_p1, %p286_p0  ;;  %p214_p7 = por %p213_p6, %p212_p5 }
  0x22   : > { %p208_p4 = pneg %p207_p2 }
  0x24   : > { %p215_p8 = pnand %p214_p7, %p208_p4 }
  0x26   : > { %218 = shalt.err (!%p215_p8)
}
  0x27   : > { %158 = dma.vmem_to_hbm [thread:$0]  (%p286_p0), %s106_s16, 128, %s305_s1, [#allocation4]  }
  0x28   : > { %238 = dma.done.wait (%p286_p0), [#allocation4], 128  }
  0x29   : > { %240 = vsyncadd (%p286_p0), [#allocation4], 4294967168 }
  0x2a PF: > { %s13_s6 = sadd.s32 1, %s243_s6  }
  0x2b   : > { %p10_p3 = scmp.ge.s32.totalorder %s13_s6, 4  }
  0x2d   :  { %12 = sbr.rel (!%p10_p3) target bundleno = 2 (0x2), region = 53 }
  0x32   :  { %118 = vsyncpa [#allocation3], 1 }
  0x33   :  { %120 = vsyncpa [#allocation3 + $0x1], 1 }
  0x34   :  { %121 = vsyncpa [#allocation4], 1 }
  0x35   :  { %123 = vsyncpa [#allocation4 + $0x1], 1 }

// kernel: tpu_custom_call.1
= control target key start
LH: loop header
LB: loop body
LE: loop exit
PB: predicated region body
PF: predicated region fallthrough
CT: control target
= control target key end

     0   :  { %11 = vsyncpa [#allocation3], 0  ;;  %s1301_s0 = inlined_call_operand.vmem [shape: f32[2,8,32], index: 0, kind: input, shape index: {}]   ;;  %s1302_s1 = inlined_call_operand.vmem [shape: bf16[32,192], index: 1, kind: input, shape index: {}]   ;;  %s1303_s2 = inlined_call_operand.vmem [shape: bf16[64,32], index: 2, kind: input, shape index: {}]   ;;  %s1304_s3 = inlined_call_operand.hbm [shape: bf16[32,32], index: 3, kind: input, shape index: {}]   ;;  %s1305_s4 = inlined_call_operand.hbm [shape: f32[1,192], index: 4, kind: input, shape index: {}]   ;;  %s1306_s5 = inlined_call_operand.vmem [shape: f32[6,32], index: 5, kind: input, shape index: {}]   ;;  %s1307_s6 = inlined_call_operand.hbm [shape: f32[2,8,32], index: 6, kind: output, shape index: {}]  }
   0x1   :  { %12 = vsyncpa [#allocation6], 0 }
   0x2   :  { %13 = vsyncpa [#allocation4], 0 }
   0x3   :  { %15 = vsyncpa [#allocation4 + $0x1], 0  ;;  %s1097_s21 = smov 0   ;;  %s1099_s22 = smov 0  }
   0x4   :  { %s1101_s23 = smov 0   ;;  %s1103_s24 = smov 0  }
   0x5 LB: > { %s1118_s25 = sadd.s32 4294967295, %s1051_s24   ;;  %s766_s26 = sadd.s32 4294967294, %s1051_s24   ;;  %s1051_s24 = sphi %s1103_s24, %s1321_s24   ;;  %s1047_s23 = sphi %s1101_s23, %s1320_s23   ;;  %s1043_s22 = sphi %s1099_s22, %s1319_s22   ;;  %s1039_s21 = sphi %s1097_s21, %s1318_s21  }
   0x6   : > { %s1122_s27 = sadd.s32 1, %s1051_s24   ;;  %s159_s28 = sadd.s32 1, %s1047_s23 }
   0x7   : > { %s156_s29 = ssub.s32 %s1051_s24, %s1122_s27  ;;  %p169_p0 = scmp.ne.s32.totalorder %s1047_s23, %s1043_s22 }
   0x8   : > { %p157_p1 = scmp.eq.s32.totalorder %s156_s29, 0  ;;  %p170_p2 = scmp.eq.s32.totalorder %s1118_s25, 1 }
   0x9   : > { %p175_p3 = scmp.ne.s32.totalorder %s1043_s22, %s1039_s21  ;;  %p176_p4 = scmp.eq.s32.totalorder %s766_s26, 1 }
   0xa   : > { %s1133_s30 = scalar_select %p157_p1, %s1047_s23, %s159_s28  }
   0xb   : > { %p1135_p5 = por %p170_p2, %p169_p0  ;;  %p1139_p6 = por %p176_p4, %p175_p3 }
   0xc   : > { %p767_p7 = scmp.ge.s32.totalorder %s1051_s24, 1  ;;  %p183_p8 = scmp.lt.s32.totalorder %s1051_s24, 3 }
   0xd   : > { %s1310_s8 = scalar_select %p1139_p6, 1, 0 }
   0xe   : > { %p1308_p9 = scmp.eq.s32.totalorder %s1118_s25, 0  ;;  %p1146_p10 = pnand %p767_p7, %p183_p8 }
   0xf   : > { %s1053_s10 = smov [#allocation2]   ;;  %s1054_s13 = smov [#allocation5]  }
  0x10   : > { %s201_s11 = sshll.u32 %s1053_s10, 4  ;;  %p855_p11 = pneg %p1146_p10  ;;  %s202_s11 = int_to_ptr.vmem [resolvable:$true] %s201_s11 }
  0x11   : > { %s215_s14 = sshll.u32 %s1054_s13, 4  ;;  %s942_s15 = scalar_lea.vmem %s202_s11, 256  ;;  %s216_s14 = int_to_ptr.vmem [resolvable:$true] %s215_s14 }
  0x12   : > { %p1154_p12 = pnand %p1308_p9, %p855_p11  ;;  %p943_p0 = scmp.ne.s32.totalorder %s202_s11, %s942_s15 }
  0x13   : > { %p950_p3 = scmp.lt.s32.totalorder %s202_s11, %s202_s11  ;;  %p951_p4 = scmp.lt.s32.totalorder %s942_s15, %s942_s15 }
  0x14   : > { %p933_p13 = pneg %p1154_p12 }
  0x15   : > { %p952_p7 = por %p951_p4, %p950_p3 }
  0x16   : > { %p945_p1 = pnand %p943_p0, %p933_p13 }
  0x18   : > { %p946_p2 = pneg %p945_p1 }
  0x1a   : > { %p953_p8 = pnand %p952_p7, %p946_p2 }
  0x1c   : > { %956 = shalt.err (!%p953_p8)
}
  0x1d   : > { %s1055_s16 = smov 64   ;;  %s1056_s17 = smov 4  }
  0x1e   : > { %858 = dma.hbm_to_vmem [thread:$0]  (!%p1154_p12), %s1304_s3, 256, %s202_s11, [#allocation3], %s1055_s16, %s1055_s16, %s1056_s17  }
  0x1f   : > { %s968_s20 = scalar_lea.vmem %s216_s14, 32  ;;  %p976_p9 = scmp.lt.s32.totalorder %s216_s14, %s216_s14 }
  0x20   : > { %p969_p11 = scmp.ne.s32.totalorder %s216_s14, %s968_s20  ;;  %p977_p6 = scmp.lt.s32.totalorder %s968_s20, %s968_s20 }
  0x22   : > { %p971_p0 = pnand %p969_p11, %p933_p13  ;;  %p978_p3 = por %p977_p6, %p976_p9 }
  0x24   : > { %p972_p1 = pneg %p971_p0 }
  0x26   : > { %p979_p2 = pnand %p978_p3, %p972_p1 }
  0x28   : > { %982 = shalt.err (!%p979_p2)
}
  0x29   : > { %861 = dma.hbm_to_vmem [thread:$0]  (!%p1154_p12), %s1305_s4, 32, %s216_s14, [#allocation6]  }
  0x2a   : > { %238 = sbr.rel (%p1146_p10) target bundleno = 2107 (0x83b), region = 44  ;;  %p1313_p4 = scmp.eq.s32.totalorder (!%p1146_p10), %s1118_s25, 0 }
  0x2f   : > { %1026 = dma.done.wait (%p1313_p4), [#allocation3], 256   ;;  %p1314_p13 = pmov %p1313_p4 }
  0x30   : > { %p1315_p7 = pmov %p1313_p4 }
  0x31   : > { %1028 = vsyncadd (%p1314_p13), [#allocation3], 4294967040 }
  0x32   : > { %1030 = dma.done.wait (%p1315_p7), [#allocation6], 32   ;;  %p1316_p6 = pmov %p1313_p4 }
  0x33   : > { %p271_p9 = scmp.lt.s32.totalorder %s1118_s25, 1  ;;  %v1057_v0 = vmov 0   ;;  %v911_v1 = vld [vmem:[%s1302_s1 + $0x14] ss:$8 sps:$4 sm:$0xff]   ;;  %v913_v2 = vld [vmem:[%s1302_s1 + $0x10] ss:$8 sps:$4 sm:$0xff]   ;;  %v290_v8 = vlaneseq }
  0x34   : > { %1032 = vsyncadd (%p1316_p6), [#allocation6], 4294967264  ;;  %356 = vmatprep.mubr.bf16.mxu0 %v1057_v0  ;;  %336 = vmatprep.subr.bf16.mxu0 %v911_v1  ;;  %v914_v3 = vld [vmem:[%s1302_s1 + $0x4] ss:$8 sps:$4 sm:$0xff]   ;;  %v916_v4 = vld [vmem:[%s1302_s1] ss:$8 sps:$4 sm:$0xff]  }
  0x35   : > { %s272_s29 = scalar_select %p271_p9, %s1118_s25, 1  ;;  %337 = vmatpush1.bf16.msra.mxu0 %v913_v2  ;;  %vm320_vm0 = vcmask 261120   ;;  %v1058_v7 = vmov 0.0   ;;  %v291_v9 = vshrl.u32 %v290_v8, 7  ;;  %v288_v11 = vld [vmem:[#allocation5] sm:$0x3] }
  0x36   : > { %338 = vmatprep.subr.bf16.mxu0 %v914_v3  ;;  %813 = vmatprep.subr.bf16.mxu1 %v1058_v7  ;;  %vm1059_vm1 = vmmov 0   ;;  %vm433_vm2 = vcmask 1043456   ;;  %s1060_s26 = smov 64   ;;  %vm370_vm3 = vcmask 523264   ;;  %vm417_vm4 = vcmask 64512   ;;  %v917_v36 = vld [vmem:[%s1303_s2 + $0x18] sm:$0xff]  }
  0x37   : > { %s775_s9 = sshll.u32 %s272_s29, 3  ;;  %v292_v10 = vsub.s32 0, %v291_v9  ;;  %815 = vmatprep.mubr.msk.bf16.mxu1 %vm1059_vm1, %v1058_v7  ;;  %v296_v12 = vsub.s32 1, %v291_v9  ;;  %v918_v37 = vld [vmem:[%s1303_s2 + $0x10] sm:$0xff]   ;;  %v919_v38 = vld [vmem:[%s1303_s2 + $0x8] sm:$0xff]   ;;  %v920_v43 = vld [vmem:[%s1303_s2] sm:$0xff]  }
  0x38   : > { %s274_s14 = scalar_lea.vmem %s1301_s0, %s775_s9  ;;  %v783_v49 = vld [vmem:[%s1306_s5] ss:$0 sm:$0xff]  ;;  %v921_v62 = vld [vmem:[#allocation2 + $0x8] sm:$0xff]   ;;  %s268_s29 = sand.u32 1, %s1043_s22  }
  0x39   : > { %v1203_v5 = vld [vmem:[%s274_s14] sm:$0xff]  ;;  %339 = vmatpush1.bf16.msra.mxu0 %v916_v4  ;;  %v293_v13 = vrot.slane %v288_v11, %v292_v10  ;;  %v297_v14 = vrot.slane %v288_v11, %v296_v12  ;;  %s774_s9 = sshll.u32 %s268_s29, 3  ;;  %s798_s14 = sshll.u32 %s1118_s25, 7 }
  0x3a   : > { %v277_v6 = vpack.c.bf16 %v1203_v5, %v1203_v5  ;;  %819 = vmatprep.subr.bf16.mxu0 %v1058_v7  ;;  %v922_v63 = vld [vmem:[#allocation2] sm:$0xff]   ;;  %s270_s15 = scalar_lea.vmem [#allocation7], %s774_s9  ;;  %s683_s19 = scalar_lea.hbm %s1307_s6, %s798_s14 }
  0x3b   : > { %v789_v4 = vld [vmem:[%s1306_s5 + $0x1] ss:$0 sm:$0xff]  ;;  %s685_s16 = sshll.u32 %s270_s15, 4  ;;  %s672_s20 = scalar_lea.sflag [#allocation4], %s268_s29  ;;  %s686_s16 = int_to_ptr.vmem [resolvable:$true] %s685_s16 }
  0x3c   : > { %780 = vmatmul.mubr.msk.bf16.vlgmr.msra.gmra.mxu0 %vm320_vm0, %v277_v6  ;;  %v790_v6 = vld [vmem:[%s1306_s5 + $0x2] ss:$0 sm:$0xff]  ;;  %s1061_s28 = smov [#allocation7]  }
  0x3d   : > { %821 = vmatprep.mubr.msk.bf16.mxu0 %vm1059_vm1, %v1058_v7  ;;  %s987_s10 = sshll.u32 %s1061_s28, 4  ;;  %s988_s10 = int_to_ptr.vmem [resolvable:$false] %s987_s10 }
  0x3e   : > { %s989_s25 = scalar_lea.vmem %s988_s10, 256  ;;  %p990_p11 = scmp.lt.s32.totalorder %s686_s16, %s988_s10 }
  0xfc   : > { %v358_v15 = vpop.f32.mrf.mxu0 }
  0xfd   : > { %v359_v16 = vadd.f32 %v358_v15, %v293_v13 }
  0xfe   : > { %v360_v17 = vpop.f32.mrf.mxu0 }
  0xff   : > { %v365_v18 = vpack.c.bf16 %v359_v16, %v359_v16  ;;  %v361_v19 = vadd.f32 %v360_v17, %v297_v14 }
 0x100   : > { %v362_v20 = vpop.f32.mrf.mxu0 }
 0x101   : > { %v366_v21 = vpack.c.bf16 %v361_v19, %v361_v19  ;;  %368 = vrot.lane.b32.xlu0 %v365_v18, %s1060_s26  ;;  %s983_s26 = scalar_lea.vmem %s686_s16, 128 }
 0x102   : > { %v363_v22 = vpop.f32.mrf.mxu0  ;;  %p984_p10 = scmp.ne.s32.totalorder %s686_s16, %s983_s26  ;;  %p991_p0 = scmp.lt.s32.totalorder %s989_s25, %s983_s26 }
 0x103   : > { %v435_v23 = vsel %vm433_vm2, %v366_v21, 0 }
 0x104   : > { %820 = vmatpush3.bf16.msra.mxu0 %v435_v23  ;;  %p985_p12 = pnand %p984_p10, %p1135_p5  ;;  %p992_p1 = por %p991_p0, %p990_p11 }
 0x105   : > { %837 = vmatprep.subr.bf16.mxu0 %v1058_v7 }
 0x106   : > { %p986_p8 = pneg %p985_p12 }
 0x108   : > { %p993_p3 = pnand %p992_p1, %p986_p8 }
 0x173   : > { %v369_v24 = vpop.permute.xlu0 %368 }
 0x174   : > { %v375_v25 = vsel %vm370_vm3, %v369_v24, 0 }
 0x175   : > { %814 = vmatpush3.bf16.xpose.msra.mxu1 %v375_v25 }
 0x176   : > { %825 = vmatprep.subr.bf16.mxu1 %v1058_v7 }
 0x17c   : > { %816 = vmatmul.mubr.msk.bf16.vlgmr.msra.gmra.mxu1 %vm370_vm3, %v365_v18 }
 0x17d   : > { %833 = vmatprep.mubr.msk.bf16.mxu1 %vm1059_vm1, %v1058_v7  ;;  %826 = vmatpush3.bf16.msra.mxu1 %v917_v36 }
 0x17e   : > { %827 = vmatprep.subr.bf16.mxu1 %v1058_v7 }
 0x181   : > { %828 = vmatpush3.bf16.msra.mxu1 %v918_v37 }
 0x182   : > { %829 = vmatprep.subr.bf16.mxu1 %v1058_v7 }
 0x185   : > { %830 = vmatpush3.bf16.msra.mxu1 %v919_v38 }
 0x186   : > { %831 = vmatprep.subr.bf16.mxu1 %v1058_v7 }
 0x189   : > { %832 = vmatpush3.bf16.msra.mxu1 %v920_v43 }
 0x23c   : > { %v411_v26 = vpop.f32.mrf.mxu1 }
 0x23d   : > { %v418_v27 = vsel %vm417_vm4, %v411_v26, -inf }
 0x23e   : > { %419 = vmax.xlane.f32.xlu0 %v418_v27  ;;  %v817_v28 = vpop.f32.mrf.mxu1  ;;  %v795_v27 = vld [vmem:[%s1306_s5 + $0x4] ss:$0 sm:$0xff] }
 0x240   : > { %v414_v29 = vpop.f32.mrf.mxu1 }
 0x241   : > { %v796_v29 = vld [vmem:[%s1306_s5 + $0x5] ss:$0 sm:$0xff] }
 0x242   : > { %v818_v30 = vpop.f32.mrf.mxu1 }
 0x2c7   : > { %v420_v31 = vpop.xlane.xlu0 %419 }
 0x2c8   : > { %v421_v32 = vsub.f32 %v411_v26, %v420_v31 }
 0x2ca   : > { %v422_v33 = vmul.f32 1.442695, %v421_v32 }
 0x2cc   : > { %923 = vpow2.f32 %v422_v33 }
 0x2d9   : > { %v924_v34 = vpop.eup %923 }
 0x2da   : > { %v424_v35 = vsel %vm417_vm4, %v924_v34, 0.0 }
 0x2db   : > { %425 = vadd.xlane.f32.xlu1 %v424_v35 }
 0x364   : > { %v426_v39 = vpop.xlane.xlu1 %425 }
 0x365   : > { %925 = vrcp.f32 %v426_v39 }
 0x372   : > { %v926_v40 = vpop.eup %925 }
 0x373   : > { %v428_v41 = vmul.f32 %v926_v40, %v924_v34 }
 0x375   : > { %v429_v42 = vpack.c.bf16 %v428_v41, %v428_v41 }
 0x377   : > { %822 = vmatmul.mubr.msk.bf16.vlgmr.msra.gmra.mxu0 %vm417_vm4, %v429_v42 }
 0x378   : > { %841 = vmatprep.mubr.msk.bf16.mxu0 %vm1059_vm1, %v1058_v7  ;;  %838 = vmatpush3.bf16.msra.mxu0 %v921_v62 }
 0x379   : > { %839 = vmatprep.subr.bf16.mxu0 %v1058_v7  ;;  %v791_v7 = vld [vmem:[%s1306_s5 + $0x3] ss:$0 sm:$0xff] }
 0x37c   : > { %840 = vmatpush3.bf16.msra.mxu0 %v922_v63 }
 0x437   : > { %v471_v44 = vpop.f32.mrf.mxu0 }
 0x438   : > { %v477_v45 = vpack.c.bf16 %v471_v44, %v471_v44 }
 0x439   : > { %v823_v46 = vpop.f32.mrf.mxu0 }
 0x43a   : > { %834 = vmatmul.mubr.msk.bf16.vlgmr.msra.gmra.mxu1 %vm370_vm3, %v477_v45 }
 0x43b   : > { %v474_v47 = vpop.f32.mrf.mxu0 }
 0x43d   : > { %v824_v48 = vpop.f32.mrf.mxu0 }
 0x4fa   : > { %v551_v50 = vpop.f32.mrf.mxu1 }
 0x4fb   : > { %v552_v51 = vadd.f32 %v783_v49, %v551_v50 }
 0x4fc   : > { %v835_v52 = vpop.f32.mrf.mxu1 }
 0x4fd   : > { %v557_v53 = vadd.f32 %v552_v51, %v1203_v5 }
 0x4fe   : > { %v554_v54 = vpop.f32.mrf.mxu1 }
 0x4ff   : > { %v558_v55 = vsel %vm320_vm0, %v557_v53, 0.0 }
 0x500   : > { %559 = vadd.xlane.f32.xlu1 %v558_v55  ;;  %v836_v56 = vpop.f32.mrf.mxu1 }
 0x589   : > { %v560_v57 = vpop.xlane.xlu1 %559 }
 0x58a   : > { %v562_v58 = vmul.f32 0.03125, %v560_v57 }
 0x58c   : > { %v563_v59 = vsub.f32 %v557_v53, %v562_v58 }
 0x58e   : > { %v564_v60 = vmul.f32 %v563_v59, %v563_v59 }
 0x590   : > { %v565_v61 = vsel %vm320_vm0, %v564_v60, 0.0 }
 0x591   : > { %566 = vadd.xlane.f32.xlu1 %v565_v61 }
 0x61a   : > { %v567_v0 = vpop.xlane.xlu1 %566 }
 0x61b   : > { %v568_v1 = vmul.f32 0.03125, %v567_v0 }
 0x61d   : > { %v569_v2 = vadd.f32 1e-05, %v568_v1 }
 0x61f   : > { %927 = vrsqrt.f32 %v569_v2 }
 0x62c   : > { %v928_v3 = vpop.eup %927 }
 0x62d   : > { %v571_v5 = vmul.f32 %v928_v3, %v563_v59 }
 0x62f   : > { %v576_v8 = vmul.f32 %v789_v4, %v571_v5 }
 0x631   : > { %v581_v9 = vadd.f32 %v790_v6, %v576_v8 }
 0x633   : > { %v582_v10 = vpack.c.bf16 %v581_v9, %v581_v9 }
 0x635   : > { %842 = vmatmul.mubr.msk.bf16.vlgmr.msra.gmra.mxu0 %vm320_vm0, %v582_v10 }
 0x6f5   : > { %v640_v11 = vpop.f32.mrf.mxu0 }
 0x6f6   : > { %v641_v12 = vadd.f32 %v791_v7, %v640_v11 }
 0x6f7   : > { %v843_v13 = vpop.f32.mrf.mxu0 }
 0x6f8   : > { %v646_v14 = vadd.f32 %v641_v12, %v581_v9 }
 0x6f9   : > { %v643_v15 = vpop.f32.mrf.mxu0 }
 0x6fa   : > { %v647_v16 = vsel %vm320_vm0, %v646_v14, 0.0 }
 0x6fb   : > { %648 = vadd.xlane.f32.xlu1 %v647_v16  ;;  %v844_v17 = vpop.f32.mrf.mxu0 }
 0x784   : > { %v649_v18 = vpop.xlane.xlu1 %648 }
 0x785   : > { %v650_v19 = vmul.f32 0.03125, %v649_v18 }
 0x787   : > { %v651_v20 = vsub.f32 %v646_v14, %v650_v19 }
 0x789   : > { %v652_v21 = vmul.f32 %v651_v20, %v651_v20 }
 0x78b   : > { %v653_v22 = vsel %vm320_vm0, %v652_v21, 0.0 }
 0x78c   : > { %654 = vadd.xlane.f32.xlu1 %v653_v22 }
 0x815   : > { %v655_v23 = vpop.xlane.xlu1 %654 }
 0x816   : > { %v656_v24 = vmul.f32 0.03125, %v655_v23 }
 0x818   : > { %v657_v25 = vadd.f32 1e-05, %v656_v24 }
 0x81a   : > { %929 = vrsqrt.f32 %v657_v25 }
 0x827   : > { %v930_v26 = vpop.eup %929 }
 0x828   : > { %v659_v28 = vmul.f32 %v930_v26, %v651_v20 }
 0x82a   : > { %v664_v30 = vmul.f32 %v795_v27, %v659_v28 }
 0x82c   : > { %v669_v31 = vadd.f32 %v796_v29, %v664_v30 }
 0x82e   : > { %670 = vst.msk [vmem:[%s270_s15] sm:$0xff] %vm320_vm0, %v669_v31 }
 0x82f   : > { %996 = shalt.err (!%p993_p3)
}
 0x830   : > { %s997_s9 = scalar_lea.hbm %s683_s19, 128  ;;  %s1001_s12 = scalar_lea.hbm %s1307_s6, 256 }
 0x831   : > { %p998_p2 = scmp.ne.s32.totalorder %s683_s19, %s997_s9  ;;  %p1002_p7 = scmp.lt.s32.totalorder %s683_s19, %s1307_s6 }
 0x832   : > { %p1003_p6 = scmp.lt.s32.totalorder %s1001_s12, %s997_s9 }
 0x833   : > { %p999_p4 = pnand %p998_p2, %p1135_p5 }
 0x834   : > { %p1004_p9 = por %p1003_p6, %p1002_p7 }
 0x835   : > { %p1000_p13 = pneg %p999_p4 }
 0x837   : > { %p1005_p10 = pnand %p1004_p9, %p1000_p13 }
 0x839   : > { %1008 = shalt.err (!%p1005_p10)
}
 0x83a   : > { %853 = dma.vmem_to_hbm [thread:$0]  (%p1135_p5), %s686_s16, 128, %s683_s19, %s672_s20  }
 0x83b PF: > { %p870_p12 = scmp.ge.s32.totalorder %s1051_s24, 2  ;;  %s697_s15 = sand.u32 1, %s1039_s21  }
 0x83c   : > { %p1317_p8 = scmp.ne.s32.totalorder %s1310_s8, 0  ;;  %s698_s17 = scalar_lea.sflag [#allocation4], %s697_s15 }
 0x83e   : > { %p863_p11 = pnand %p870_p12, %p1317_p8 }
 0x840   : > { %p864_p0 = pneg %p863_p11 }
 0x842   : > { %1034 = dma.done.wait (%p864_p0), %s698_s17, 128  }
 0x843   : > { %1036 = vsyncadd (%p864_p0), %s698_s17, 4294967168  ;;  %p18_p1 = scmp.ge.s32.totalorder %s1122_s27, 4   ;;  %s1318_s21 = smov %s1043_s22 }
 0x844   : > { %s1319_s22 = smov %s1047_s23  ;;  %s1320_s23 = smov %s1133_s30 }
 0x845   : > { %s1321_s24 = smov %s1122_s27  ;;  %20 = sbr.rel (!%p18_p1) target bundleno = 5 (0x5), region = 88 }
 0x84a   :  { %703 = vsyncpa [#allocation3], 1 }
 0x84b   :  { %705 = vsyncpa [#allocation3 + $0x1], 1 }
 0x84c   :  { %706 = vsyncpa [#allocation6], 1 }
 0x84d   :  { %707 = vsyncpa [#allocation4], 1 }
 0x84e   :  { %709 = vsyncpa [#allocation4 + $0x1], 1 }

</bundles_post_ra>
